<compile_context>
chip_gen: v7x
topology: tpu7x:2x2x1
jax: 0.10.0
libtpu: 0.0.40
codegen_flags: <defaults>
</compile_context>

<pallas_src>
import functools

import jax
import jax.numpy as jnp
from jax.experimental import pallas as pl
from jax.experimental.pallas import tpu as pltpu

LANE = 128
_VMEM_BUDGET = 12 * 1024 * 1024   # conservative vs. v5e's 16 MiB scoped default


def _round_up(x, m):
    return ((x + m - 1) // m) * m


def _pick_spatial_block(s_total, max_blk):
    """Largest divisor of s_total that is <= max_blk and (== s_total or % 8 == 0)."""
    if s_total <= max_blk:
        return s_total
    for d in range(max_blk, 0, -1):
        if s_total % d == 0 and d % 8 == 0:
            return d
    return None


def _rl_kernel(x_ref, e_ref, w_ref, b_ref, o_ref, *, c_in, c_out):
    # x_ref : (Bt, c_in, S, 128)   input dtype, VMEM  (image channels)
    # e_ref : (Bt, S, 128)         input dtype, VMEM  (pre-gathered embedding row)
    # w_ref : (c_in + 1, c_out)    f32, SMEM          (BN-folded 1x1 conv weight)
    # b_ref : (c_out,)             f32, SMEM          (BN-folded bias)
    # o_ref : (Bt, c_out, S, 128)  output dtype, VMEM
    e = e_ref[...].astype(jnp.float32)                          # (Bt, S, 128)
    xs = [x_ref[:, ci, :, :].astype(jnp.float32) for ci in range(c_in)]

    for co in range(c_out):                    # static unroll (c_out = 3)
        acc = w_ref[c_in, co] * e              # embedding = input channel c_in
        for ci in range(c_in):                 # static unroll (c_in = 3)
            acc = acc + w_ref[ci, co] * xs[ci]
        o_ref[:, co, :, :] = jnp.maximum(acc + b_ref[co], 0.0).astype(o_ref.dtype)


def rl_forward(x, labels, emb_table, conv_weight, bn_gamma, bn_beta,
               bn_running_mean, bn_running_var, eps=1e-5, max_spatial_block=512):
    """Forward pass of RL.

    x            : (B, 3, H, W)
    labels       : (B,) int
    emb_table    : (num_classes, H*W)            (nn.Embedding weight)
    conv_weight  : (4, 3, 1, 1)                  (ConvTranspose2d weight, in,out,kh,kw)
    bn_*         : (3,)                          (BatchNorm2d params / running stats)
    returns      : (B, 3, H, W), dtype of x
    """
    B, c_in, H, W = x.shape
    HW = H * W
    num_classes, emb_dim = emb_table.shape
    assert emb_dim == HW, "embedding dim must equal img_size * img_size"
    c_out = conv_weight.shape[1]

    # ---- fold BatchNorm (inference / running-stats form) into the 1x1 conv ----
    w2d = conv_weight.reshape(c_in + 1, c_out).astype(jnp.float32)       # (4, 3)
    scale = (bn_gamma / jnp.sqrt(bn_running_var + eps)).astype(jnp.float32)
    w_eff = w2d * scale[None, :]                                         # (4, 3)
    b_eff = (bn_beta - bn_running_mean * scale).astype(jnp.float32)      # (3,)

    # ---- gather only the B needed embedding rows (not the whole table) ----
    emd = jnp.take(emb_table, labels.astype(jnp.int32), axis=0)          # (B, HW)

    # ---- lane/sublane-dense spatial packing: HW -> (S_total, 128) ----
    HW_pad = _round_up(HW, LANE)
    s_total = HW_pad // LANE
    s_blk = _pick_spatial_block(s_total, max_spatial_block)
    if s_blk is None:
        # no well-shaped divisor; pad up to a multiple of 8 sublane rows
        s_total = _round_up(s_total, 8)
        HW_pad = s_total * LANE
        s_blk = _pick_spatial_block(s_total, max_spatial_block)

    x_flat = x.reshape(B, c_in, HW)                 # free reshape, no dtype cast
    if HW_pad != HW:
        # Only when H*W is not a multiple of 128 (single small pad copy).
        x_flat = jnp.pad(x_flat, ((0, 0), (0, 0), (0, HW_pad - HW)))
        emd = jnp.pad(emd, ((0, 0), (0, HW_pad - HW)))
    x_p = x_flat.reshape(B, c_in, s_total, LANE)
    e_p = emd.reshape(B, s_total, LANE)

    out_dtype = x.dtype
    xb = jnp.dtype(x.dtype).itemsize
    eb = jnp.dtype(emb_table.dtype).itemsize
    ob = jnp.dtype(out_dtype).itemsize
    bytes_per_pix = c_in * xb + eb + c_out * ob     # HBM bytes per spatial element/batch

    # ---- batch blocking: biggest Bt (divisor of B, <= 8) that fits VMEM ----
    n_s = s_total // s_blk
    bt = 1
    for cand in range(min(B, 8), 0, -1):
        if B % cand == 0 and 2 * cand * s_blk * LANE * bytes_per_pix <= _VMEM_BUDGET:
            bt = cand
            break
    # keep >= 2 independent grid steps when possible (v7x has 2 TensorCores)
    if bt > 1 and (B // bt) * n_s < 2:
        for cand in range(bt - 1, 0, -1):
            if B % cand == 0:
                bt = cand
                break
    grid = (B // bt, n_s)

    kernel = functools.partial(_rl_kernel, c_in=c_in, c_out=c_out)

    out_p = pl.pallas_call(
        kernel,
        out_shape=jax.ShapeDtypeStruct((B, c_out, s_total, LANE), out_dtype),
        grid_spec=pltpu.PrefetchScalarGridSpec(
            num_scalar_prefetch=0,
            grid=grid,
            in_specs=[
                # image channels: Bt batch rows, all channels, one spatial slab
                pl.BlockSpec((bt, c_in, s_blk, LANE), lambda b, s: (b, 0, s, 0)),
                # pre-gathered embedding rows
                pl.BlockSpec((bt, s_blk, LANE), lambda b, s: (b, s, 0)),
                # tiny folded parameters live in SMEM (scalar reads in-kernel)
                pl.BlockSpec(memory_space=pltpu.MemorySpace.SMEM),
                pl.BlockSpec(memory_space=pltpu.MemorySpace.SMEM),
            ],
            out_specs=pl.BlockSpec((bt, c_out, s_blk, LANE), lambda b, s: (b, 0, s, 0)),
        ),
        compiler_params=pltpu.CompilerParams(
            dimension_semantics=("parallel", "parallel")),
        cost_estimate=pl.CostEstimate(
            flops=2 * B * HW_pad * (c_in + 1) * c_out,
            transcendentals=0,
            bytes_accessed=B * HW_pad * bytes_per_pix),
    )(x_p, e_p, w_eff, b_eff)

    out = out_p.reshape(B, c_out, HW_pad)
    if HW_pad != HW:
        out = out[:, :, :HW]
    return out.reshape(B, c_out, H, W)


if __name__ == "__main__":
    key = jax.random.PRNGKey(0)
    k1, k2, k3, k4, k5, k6, k7, k8 = jax.random.split(key, 8)

    B = 2
    IMG = 16
    NUM_CLASSES = 10
    C_IN, C_OUT = 3, 3
    EPS = 1e-5

    x = jax.random.normal(k1, (B, C_IN, IMG, IMG), jnp.float32)
    labels = jax.random.randint(k2, (B,), 0, NUM_CLASSES, jnp.int32)
    emb_table = jax.random.normal(k3, (NUM_CLASSES, IMG * IMG), jnp.float32)

    # ConvTranspose2d(4, 3, 1, 1, bias=False) default init: U(-1/sqrt(4), 1/sqrt(4))
    bound = 1.0 / (4 ** 0.5)
    conv_weight = jax.random.uniform(k4, (C_IN + 1, C_OUT, 1, 1), jnp.float32, -bound, bound)

    # BatchNorm2d(3) parameters / running stats (non-trivial so the math is exercised)
    bn_gamma = jax.random.uniform(k5, (C_OUT,), jnp.float32, 0.5, 1.5)
    bn_beta = jax.random.uniform(k6, (C_OUT,), jnp.float32, -0.5, 0.5)
    bn_mean = jax.random.uniform(k7, (C_OUT,), jnp.float32, -0.5, 0.5)
    bn_var = jax.random.uniform(k8, (C_OUT,), jnp.float32, 0.5, 1.5)

    out = rl_forward(x, labels, emb_table, conv_weight,
                     bn_gamma, bn_beta, bn_mean, bn_var, eps=EPS)
    out = jax.block_until_ready(out)

    # ---- plain-JAX reference ----
    emd = emb_table[labels].reshape(B, 1, IMG, IMG)
    xc = jnp.concatenate([x, emd], axis=1)                       # (B, 4, H, W)
    w2d = conv_weight.reshape(C_IN + 1, C_OUT)
    y = jnp.einsum('bihw,io->bohw', xc, w2d)                     # 1x1 transposed conv
    scale = bn_gamma / jnp.sqrt(bn_var + EPS)
    shift = bn_beta - bn_mean * scale
    ref = jnp.maximum(y * scale[None, :, None, None] + shift[None, :, None, None], 0.0)

    assert out.shape == (B, C_OUT, IMG, IMG)
    assert jnp.allclose(out, ref, atol=1e-5, rtol=1e-5), \
        float(jnp.max(jnp.abs(out - ref)))

    print("KERNEL_OK")
</pallas_src>

<mosaic_0001>
module attributes {stable_mosaic.version = 11 : i64} {
  func.func @_rl_kernel(%arg0: i32, %arg1: i32, %arg2: memref<1x3x2x128xf32, #tpu.memory_space<vmem>>, %arg3: memref<1x2x128xf32, #tpu.memory_space<vmem>>, %arg4: memref<4x3xf32, #tpu.memory_space<smem>>, %arg5: memref<3xf32, #tpu.memory_space<smem>>, %arg6: memref<1x3x2x128xf32, #tpu.memory_space<vmem>>) attributes {dimension_semantics = [#tpu.dimension_semantics<parallel>, #tpu.dimension_semantics<parallel>], iteration_bounds = array<i64: 2, 1>, scalar_prefetch = 0 : i64, scratch_operands = 0 : i64, tpu.core_type = #tpu.core_type<tc>, window_params = [{transform_indices = @transform_0, window_bounds = array<i64: 1, 3, 2, 128>}, {transform_indices = @transform_1, window_bounds = array<i64: 1, 2, 128>}, {transform_indices = @transform_2, window_bounds = array<i64: 4, 3>}, {transform_indices = @transform_3, window_bounds = array<i64: 3>}, {transform_indices = @transform_4, window_bounds = array<i64: 1, 3, 2, 128>}]} {
    %c0 = arith.constant 0 : index
    %c0_0 = arith.constant 0 : index
    %c0_1 = arith.constant 0 : index
    %0 = vector.load %arg3[%c0, %c0_0, %c0_1] : memref<1x2x128xf32, #tpu.memory_space<vmem>>, vector<1x2x128xf32>
    %c0_2 = arith.constant 0 : index
    %c0_3 = arith.constant 0 : index
    %c0_4 = arith.constant 0 : index
    %c0_5 = arith.constant 0 : index
    %1 = vector.load %arg2[%c0_2, %c0_3, %c0_4, %c0_5] : memref<1x3x2x128xf32, #tpu.memory_space<vmem>>, vector<1x1x2x128xf32>
    %2 = vector.shape_cast %1 : vector<1x1x2x128xf32> to vector<1x2x128xf32>
    %c0_6 = arith.constant 0 : index
    %c1 = arith.constant 1 : index
    %c0_7 = arith.constant 0 : index
    %c0_8 = arith.constant 0 : index
    %3 = vector.load %arg2[%c0_6, %c1, %c0_7, %c0_8] : memref<1x3x2x128xf32, #tpu.memory_space<vmem>>, vector<1x1x2x128xf32>
    %4 = vector.shape_cast %3 : vector<1x1x2x128xf32> to vector<1x2x128xf32>
    %c0_9 = arith.constant 0 : index
    %c2 = arith.constant 2 : index
    %c0_10 = arith.constant 0 : index
    %c0_11 = arith.constant 0 : index
    %5 = vector.load %arg2[%c0_9, %c2, %c0_10, %c0_11] : memref<1x3x2x128xf32, #tpu.memory_space<vmem>>, vector<1x1x2x128xf32>
    %6 = vector.shape_cast %5 : vector<1x1x2x128xf32> to vector<1x2x128xf32>
    %c3 = arith.constant 3 : index
    %c0_12 = arith.constant 0 : index
    %7 = memref.load %arg4[%c3, %c0_12] : memref<4x3xf32, #tpu.memory_space<smem>>
    %8 = vector.broadcast %7 : f32 to vector<1x2x128xf32>
    %9 = arith.mulf %8, %0 : vector<1x2x128xf32>
    %c0_13 = arith.constant 0 : index
    %c0_14 = arith.constant 0 : index
    %10 = memref.load %arg4[%c0_13, %c0_14] : memref<4x3xf32, #tpu.memory_space<smem>>
    %11 = vector.broadcast %10 : f32 to vector<1x2x128xf32>
    %12 = arith.mulf %11, %2 : vector<1x2x128xf32>
    %13 = arith.addf %9, %12 : vector<1x2x128xf32>
    %c1_15 = arith.constant 1 : index
    %c0_16 = arith.constant 0 : index
    %14 = memref.load %arg4[%c1_15, %c0_16] : memref<4x3xf32, #tpu.memory_space<smem>>
    %15 = vector.broadcast %14 : f32 to vector<1x2x128xf32>
    %16 = arith.mulf %15, %4 : vector<1x2x128xf32>
    %17 = arith.addf %13, %16 : vector<1x2x128xf32>
    %c2_17 = arith.constant 2 : index
    %c0_18 = arith.constant 0 : index
    %18 = memref.load %arg4[%c2_17, %c0_18] : memref<4x3xf32, #tpu.memory_space<smem>>
    %19 = vector.broadcast %18 : f32 to vector<1x2x128xf32>
    %20 = arith.mulf %19, %6 : vector<1x2x128xf32>
    %21 = arith.addf %17, %20 : vector<1x2x128xf32>
    %c0_19 = arith.constant 0 : index
    %22 = memref.load %arg5[%c0_19] : memref<3xf32, #tpu.memory_space<smem>>
    %23 = vector.broadcast %22 : f32 to vector<1x2x128xf32>
    %24 = arith.addf %21, %23 : vector<1x2x128xf32>
    %cst = arith.constant 0.000000e+00 : f32
    %25 = vector.broadcast %cst : f32 to vector<1x2x128xf32>
    %26 = arith.maximumf %24, %25 : vector<1x2x128xf32>
    %c0_20 = arith.constant 0 : index
    %c0_21 = arith.constant 0 : index
    %c0_22 = arith.constant 0 : index
    %c0_23 = arith.constant 0 : index
    %27 = vector.load %arg6[%c0_20, %c0_21, %c0_22, %c0_23] : memref<1x3x2x128xf32, #tpu.memory_space<vmem>>, vector<1x1x2x128xf32>
    %28 = vector.shape_cast %27 : vector<1x1x2x128xf32> to vector<1x2x128xf32>
    %29 = vector.shape_cast %26 : vector<1x2x128xf32> to vector<1x1x2x128xf32>
    tpu.vector_store %arg6[%c0_20, %c0_21, %c0_22, %c0_23], %29 {strides = array<i32>} : memref<1x3x2x128xf32, #tpu.memory_space<vmem>>, vector<1x1x2x128xf32>,
    %c3_24 = arith.constant 3 : index
    %c1_25 = arith.constant 1 : index
    %30 = memref.load %arg4[%c3_24, %c1_25] : memref<4x3xf32, #tpu.memory_space<smem>>
    %31 = vector.broadcast %30 : f32 to vector<1x2x128xf32>
    %32 = arith.mulf %31, %0 : vector<1x2x128xf32>
    %c0_26 = arith.constant 0 : index
    %c1_27 = arith.constant 1 : index
    %33 = memref.load %arg4[%c0_26, %c1_27] : memref<4x3xf32, #tpu.memory_space<smem>>
    %34 = vector.broadcast %33 : f32 to vector<1x2x128xf32>
    %35 = arith.mulf %34, %2 : vector<1x2x128xf32>
    %36 = arith.addf %32, %35 : vector<1x2x128xf32>
    %c1_28 = arith.constant 1 : index
    %c1_29 = arith.constant 1 : index
    %37 = memref.load %arg4[%c1_28, %c1_29] : memref<4x3xf32, #tpu.memory_space<smem>>
    %38 = vector.broadcast %37 : f32 to vector<1x2x128xf32>
    %39 = arith.mulf %38, %4 : vector<1x2x128xf32>
    %40 = arith.addf %36, %39 : vector<1x2x128xf32>
    %c2_30 = arith.constant 2 : index
    %c1_31 = arith.constant 1 : index
    %41 = memref.load %arg4[%c2_30, %c1_31] : memref<4x3xf32, #tpu.memory_space<smem>>
    %42 = vector.broadcast %41 : f32 to vector<1x2x128xf32>
    %43 = arith.mulf %42, %6 : vector<1x2x128xf32>
    %44 = arith.addf %40, %43 : vector<1x2x128xf32>
    %c1_32 = arith.constant 1 : index
    %45 = memref.load %arg5[%c1_32] : memref<3xf32, #tpu.memory_space<smem>>
    %46 = vector.broadcast %45 : f32 to vector<1x2x128xf32>
    %47 = arith.addf %44, %46 : vector<1x2x128xf32>
    %cst_33 = arith.constant 0.000000e+00 : f32
    %48 = vector.broadcast %cst_33 : f32 to vector<1x2x128xf32>
    %49 = arith.maximumf %47, %48 : vector<1x2x128xf32>
    %c0_34 = arith.constant 0 : index
    %c1_35 = arith.constant 1 : index
    %c0_36 = arith.constant 0 : index
    %c0_37 = arith.constant 0 : index
    %50 = vector.load %arg6[%c0_34, %c1_35, %c0_36, %c0_37] : memref<1x3x2x128xf32, #tpu.memory_space<vmem>>, vector<1x1x2x128xf32>
    %51 = vector.shape_cast %50 : vector<1x1x2x128xf32> to vector<1x2x128xf32>
    %52 = vector.shape_cast %49 : vector<1x2x128xf32> to vector<1x1x2x128xf32>
    tpu.vector_store %arg6[%c0_34, %c1_35, %c0_36, %c0_37], %52 {strides = array<i32>} : memref<1x3x2x128xf32, #tpu.memory_space<vmem>>, vector<1x1x2x128xf32>,
    %c3_38 = arith.constant 3 : index
    %c2_39 = arith.constant 2 : index
    %53 = memref.load %arg4[%c3_38, %c2_39] : memref<4x3xf32, #tpu.memory_space<smem>>
    %54 = vector.broadcast %53 : f32 to vector<1x2x128xf32>
    %55 = arith.mulf %54, %0 : vector<1x2x128xf32>
    %c0_40 = arith.constant 0 : index
    %c2_41 = arith.constant 2 : index
    %56 = memref.load %arg4[%c0_40, %c2_41] : memref<4x3xf32, #tpu.memory_space<smem>>
    %57 = vector.broadcast %56 : f32 to vector<1x2x128xf32>
    %58 = arith.mulf %57, %2 : vector<1x2x128xf32>
    %59 = arith.addf %55, %58 : vector<1x2x128xf32>
    %c1_42 = arith.constant 1 : index
    %c2_43 = arith.constant 2 : index
    %60 = memref.load %arg4[%c1_42, %c2_43] : memref<4x3xf32, #tpu.memory_space<smem>>
    %61 = vector.broadcast %60 : f32 to vector<1x2x128xf32>
    %62 = arith.mulf %61, %4 : vector<1x2x128xf32>
    %63 = arith.addf %59, %62 : vector<1x2x128xf32>
    %c2_44 = arith.constant 2 : index
    %c2_45 = arith.constant 2 : index
    %64 = memref.load %arg4[%c2_44, %c2_45] : memref<4x3xf32, #tpu.memory_space<smem>>
    %65 = vector.broadcast %64 : f32 to vector<1x2x128xf32>
    %66 = arith.mulf %65, %6 : vector<1x2x128xf32>
    %67 = arith.addf %63, %66 : vector<1x2x128xf32>
    %c2_46 = arith.constant 2 : index
    %68 = memref.load %arg5[%c2_46] : memref<3xf32, #tpu.memory_space<smem>>
    %69 = vector.broadcast %68 : f32 to vector<1x2x128xf32>
    %70 = arith.addf %67, %69 : vector<1x2x128xf32>
    %cst_47 = arith.constant 0.000000e+00 : f32
    %71 = vector.broadcast %cst_47 : f32 to vector<1x2x128xf32>
    %72 = arith.maximumf %70, %71 : vector<1x2x128xf32>
    %c0_48 = arith.constant 0 : index
    %c2_49 = arith.constant 2 : index
    %c0_50 = arith.constant 0 : index
    %c0_51 = arith.constant 0 : index
    %73 = vector.load %arg6[%c0_48, %c2_49, %c0_50, %c0_51] : memref<1x3x2x128xf32, #tpu.memory_space<vmem>>, vector<1x1x2x128xf32>
    %74 = vector.shape_cast %73 : vector<1x1x2x128xf32> to vector<1x2x128xf32>
    %75 = vector.shape_cast %72 : vector<1x2x128xf32> to vector<1x1x2x128xf32>
    tpu.vector_store %arg6[%c0_48, %c2_49, %c0_50, %c0_51], %75 {strides = array<i32>} : memref<1x3x2x128xf32, #tpu.memory_space<vmem>>, vector<1x1x2x128xf32>,
    return
  }
  func.func @transform_0(%arg0: i32, %arg1: i32) -> (i32, i32, i32, i32) {
    %c0_i32 = arith.constant 0 : i32
    %c0_i32_0 = arith.constant 0 : i32
    %c0_i32_1 = arith.constant 0 : i32
    return %arg0, %c0_i32, %arg1, %c0_i32_0 : i32, i32, i32, i32
  }
  func.func @transform_1(%arg0: i32, %arg1: i32) -> (i32, i32, i32) {
    %c0_i32 = arith.constant 0 : i32
    %c0_i32_0 = arith.constant 0 : i32
    return %arg0, %arg1, %c0_i32 : i32, i32, i32
  }
  func.func @transform_2(%arg0: i32, %arg1: i32) -> (i32, i32) {
    %c0_i32 = arith.constant 0 : i32
    %c0_i32_0 = arith.constant 0 : i32
    %c0_i32_1 = arith.constant 0 : i32
    return %c0_i32, %c0_i32_0 : i32, i32
  }
  func.func @transform_3(%arg0: i32, %arg1: i32) -> i32 {
    %c0_i32 = arith.constant 0 : i32
    %c0_i32_0 = arith.constant 0 : i32
    return %c0_i32 : i32
  }
  func.func @transform_4(%arg0: i32, %arg1: i32) -> (i32, i32, i32, i32) {
    %c0_i32 = arith.constant 0 : i32
    %c0_i32_0 = arith.constant 0 : i32
    %c0_i32_1 = arith.constant 0 : i32
    return %arg0, %c0_i32, %arg1, %c0_i32_0 : i32, i32, i32, i32
  }
}

</mosaic_0001>

<bundles_post_ra>
// kernel: tpu_custom_call.1
= control target key start
LH: loop header
LB: loop body
LE: loop exit
PB: predicated region body
PF: predicated region fallthrough
CT: control target
= control target key end

     0   :  { %s1124_s0 = inlined_call_operand.hbm [shape: f32[2,3,2,128], index: 0, kind: input, shape index: {}]   ;;  %s1125_s1 = inlined_call_operand.hbm [shape: f32[2,2,128], index: 1, kind: input, shape index: {}]   ;;  %s1126_s2 = inlined_call_operand.vmem [shape: f32[4,3], index: 2, kind: input, shape index: {}]   ;;  %s1127_s3 = inlined_call_operand.vmem [shape: f32[3], index: 3, kind: input, shape index: {}]   ;;  %s1128_s4 = inlined_call_operand.hbm [shape: f32[2,3,2,128], index: 4, kind: output, shape index: {}]  }
   0x1   :  { %1135 = sst [smem:[#allocation17_spill]] %s1124_s0 }
   0x2   :  { %1136 = sst [smem:[#allocation18_spill]] %s1126_s2 }
   0x3   :  { %1137 = sst [smem:[#allocation19_spill]] %s1127_s3 }
   0x4   :  { %9 = vsyncpa [#allocation3], 0 }
   0x5   :  { %11 = vsyncpa [#allocation3 + $0x1], 0 }
   0x6   :  { %12 = vsyncpa [#allocation7], 0 }
   0x7   :  { %14 = vsyncpa [#allocation7 + $0x1], 0 }
   0x8   :  { %15 = vsyncpa [#allocation5], 0 }
   0x9   :  { %16 = vsyncpa [#allocation10], 0 }
   0xa   :  { %17 = vsyncpa [#allocation4], 0 }
   0xb   :  { %19 = vsyncpa [#allocation4 + $0x1], 0  ;;  %s863_s15 = smov 0   ;;  %s865_s16 = smov 0  }
   0xc   :  { %s867_s17 = smov 0   ;;  %s869_s18 = smov 0  }
   0xd   :  { %s871_s19 = smov 0   ;;  %s873_s20 = smov 0  }
   0xe LB: > { %s514_s21 = sadd.s32 4294967295, %s827_s20   ;;  %s515_s22 = sadd.s32 4294967294, %s827_s20   ;;  %s827_s20 = sphi %s873_s20, %s25_s20   ;;  %s823_s19 = sphi %s871_s19, %s1160_s19   ;;  %s819_s18 = sphi %s869_s18, %s1159_s18   ;;  %s815_s17 = sphi %s867_s17, %s1158_s17   ;;  %s811_s16 = sphi %s865_s16, %s1157_s16   ;;  %s807_s15 = sphi %s863_s15, %s1156_s15  }
   0xf   : > { %s46_s23 = sadd.s32 1, %s815_s17  ;;  %p53_p0 = scmp.ne.s32.totalorder %s815_s17, %s811_s16 }
  0x10   : > { %p54_p1 = scmp.eq.s32.totalorder %s827_s20, 0  ;;  %p59_p2 = scmp.ne.s32.totalorder %s811_s16, %s807_s15 }
  0x11   : > { %p901_p3 = scmp.eq.s32.totalorder %s514_s21, 0  ;;  %p155_p4 = scmp.eq.s32.totalorder %s514_s21, 1 }
  0x12   : > { %p905_p5 = por %p54_p1, %p53_p0  ;;  %p161_p6 = scmp.eq.s32.totalorder %s515_s22, 1 }
  0x13   : > { %s1138_s24 = scalar_select %p901_p3, 1, 0 }
  0x14   : > { %p911_p7 = por %p901_p3, %p59_p2  ;;  %p915_p8 = por %p155_p4, %p53_p0 }
  0x15   : > { %p919_p9 = por %p161_p6, %p59_p2  ;;  %p516_p10 = scmp.ge.s32.totalorder %s827_s20, 1 }
  0x16   : > { %s1140_s26 = scalar_select %p911_p7, 1, 0 }
  0x17   : > { %s1141_s27 = scalar_select %p915_p8, 1, 0 }
  0x18   : > { %s1142_s28 = scalar_select %p919_p9, 1, 0 }
  0x19   : > { %p168_p11 = scmp.lt.s32.totalorder %s827_s20, 3  ;;  %s1143_s2 = sld [smem:[#allocation18_spill]] }
  0x1a   : > { %p585_p0 = scmp.lt.s32.totalorder %s827_s20, 2  ;;  %s1145_s3 = sld [smem:[#allocation19_spill]] }
  0x1b   : > { %p928_p12 = pnand %p516_p10, %p168_p11 }
  0x1c   : > { %p941_p2 = pnand %p585_p0, %p905_p5 }
  0x1d   : > { %s1144_s6 = scalar_select %p928_p12, 1, 0 }
  0x1e   : > { %p565_p1 = pneg %p928_p12 }
  0x1f   : > { %s181_s5 = sshll.u32 %s1143_s2, 4  ;;  %s182_s5 = int_to_ptr.vmem [resolvable:$true] %s181_s5 }
  0x20   : > { %s192_s9 = sshll.u32 %s1145_s3, 4  ;;  %p947_p4 = pnand %p565_p1, %p901_p3  ;;  %s193_s9 = int_to_ptr.vmem [resolvable:$true] %s192_s9 }
  0x21   : > { %s1146_s10 = scalar_select %p941_p2, 1, 0 }
  0x22   : > { %s643_s12 = scalar_lea.vmem %s182_s5, 64  ;;  %p645_p10 = pneg %p947_p4 }
  0x23   : > { %p644_p6 = scmp.ne.s32.totalorder %s182_s5, %s643_s12  ;;  %p651_p9 = scmp.lt.s32.totalorder %s182_s5, %s182_s5 }
  0x24   : > { %p652_p8 = scmp.lt.s32.totalorder %s643_s12, %s643_s12 }
  0x25   : > { %p646_p11 = pnand %p645_p10, %p644_p6 }
  0x26   : > { %p653_p7 = por %p652_p8, %p651_p9 }
  0x27   : > { %p647_p13 = pneg %p646_p11 }
  0x29   : > { %p654_p5 = pnand %p653_p7, %p647_p13 }
  0x2b   : > { %657 = shalt.err (!%p654_p5)
}
  0x2c   : > { %s829_s13 = smov [#allocation8]   ;;  %s658_s14 = scalar_lea.vmem %s193_s9, 16 }
  0x2d   : > { %568 = dma.vmem_to_smem (!%p947_p4), %s182_s5, 64, %s829_s13, [#allocation5]  }
  0x2e   : > { %p659_p0 = scmp.ne.s32.totalorder %s193_s9, %s658_s14  ;;  %p666_p12 = scmp.lt.s32.totalorder %s193_s9, %s193_s9 }
  0x2f   : > { %p667_p2 = scmp.lt.s32.totalorder %s658_s14, %s658_s14 }
  0x30   : > { %p661_p1 = pnand %p659_p0, %p645_p10 }
  0x31   : > { %p668_p6 = por %p667_p2, %p666_p12 }
  0x32   : > { %p662_p3 = pneg %p661_p1 }
  0x34   : > { %p669_p11 = pnand %p668_p6, %p662_p3 }
  0x36   : > { %672 = shalt.err (!%p669_p11)
}
  0x37   : > { %s830_s21 = smov [#allocation9]   ;;  %s37_s22 = sadd.s32 1, %s823_s19 }
  0x38   : > { %571 = dma.vmem_to_smem (!%p947_p4), %s193_s9, 16, %s830_s21, [#allocation10]  }
  0x39   : > { %s959_s25 = sand.u32 1, %s815_s17   ;;  %p39_p7 = scmp.ge.s32.totalorder %s37_s22, 2 }
  0x3a   : > { %s547_s29 = smul.u32 6, %s959_s25  ;;  %s1148_s0 = sld [smem:[#allocation17_spill]] }
  0x3b   : > { %s1162_s22 = smov (%p39_p7, %s37_s22), 0  ;;  %s548_s30 = smul.u32 96, %s823_s19 }
  0x3c   : > { %s41_s5 = ssub.s32 %s823_s19, %s1162_s22  ;;  %s207_s7 = scalar_lea.vmem [#allocation2], %s547_s29 }
  0x3d   : > { %s215_s8 = sshll.u32 %s207_s7, 4  ;;  %p44_p3 = scmp.eq.s32.totalorder %s41_s5, 0  ;;  %s972_s8 = int_to_ptr.vmem [resolvable:$true] %s215_s8 }
  0x3e   : > { %s204_s14 = scalar_lea.sflag [#allocation3], %s959_s25  ;;  %p1149_p9 = scmp.ne.s32.totalorder %s1146_s10, 0 }
  0x3f   : > { %s977_s13 = scalar_select %p44_p3, %s815_s17, %s46_s23  }
  0x40   : > { %s970_s9 = scalar_lea.hbm %s1148_s0, %s548_s30  ;;  %p675_p12 = pneg %p1149_p9 }
  0x41   : > { %s673_s21 = scalar_lea.hbm %s970_s9, 96  ;;  %s678_s5 = scalar_lea.hbm %s1148_s0, 192 }
  0x42   : > { %p674_p8 = scmp.ne.s32.totalorder %s970_s9, %s673_s21  ;;  %p679_p4 = scmp.lt.u32.totalorder %s970_s9, %s1148_s0 }
  0x43   : > { %p680_p10 = scmp.lt.u32.totalorder %s678_s5, %s673_s21  ;;  %p682_p0 = scmp.lt.u32.totalorder %s673_s21, %s970_s9 }
  0x44   : > { %p676_p13 = pnand %p675_p12, %p674_p8 }
  0x45   : > { %p681_p5 = por %p680_p10, %p679_p4 }
  0x46   : > { %p677_p2 = pneg %p676_p13 }
  0x47   : > { %p683_p1 = por %p682_p0, %p681_p5 }
  0x49   : > { %p684_p6 = pnand %p683_p1, %p677_p2 }
  0x4b   : > { %687 = shalt.err (!%p684_p6)
}
  0x4c   : > { %s688_s23 = scalar_lea.vmem %s972_s8, 96  ;;  %s831_s12 = smov [#allocation2]  }
  0x4d   : > { %p689_p11 = scmp.ne.s32.totalorder %s972_s8, %s688_s23  ;;  %s693_s29 = sshll.u32 %s831_s12, 4  ;;  %s694_s29 = int_to_ptr.vmem [resolvable:$false] %s693_s29 }
  0x4e   : > { %s695_s30 = scalar_lea.vmem %s694_s29, 192  ;;  %p696_p8 = scmp.lt.s32.totalorder %s972_s8, %s694_s29 }
  0x4f   : > { %p691_p7 = pnand %p689_p11, %p675_p12  ;;  %p697_p13 = scmp.lt.s32.totalorder %s695_s30, %s688_s23 }
  0x51   : > { %p692_p3 = pneg %p691_p7  ;;  %p698_p4 = por %p697_p13, %p696_p8 }
  0x53   : > { %p699_p10 = pnand %p698_p4, %p692_p3 }
  0x55   : > { %702 = shalt.err (!%p699_p10)
}
  0x56   : > { %s832_s21 = smov 32   ;;  %s833_s5 = smov 2  }
  0x57   : > { %575 = dma.hbm_to_vmem [thread:$0]  (!%p1149_p9), %s970_s9, 96, %s972_s8, %s204_s14, %s832_s21, %s832_s21, %s833_s5  }
  0x58   : > { %s521_s7 = sshll.u32 %s959_s25, 1  ;;  %s522_s11 = sshll.u32 %s823_s19, 5 }
  0x59   : > { %s1012_s29 = scalar_lea.hbm %s1125_s1, %s522_s11  ;;  %s229_s30 = scalar_lea.vmem [#allocation6], %s521_s7 }
  0x5a   : > { %s237_s0 = sshll.u32 %s229_s30, 4  ;;  %s226_s2 = scalar_lea.sflag [#allocation7], %s959_s25  ;;  %s238_s0 = int_to_ptr.vmem [resolvable:$true] %s237_s0 }
  0x5b   : > { %s703_s3 = scalar_lea.hbm %s1012_s29, 32  ;;  %s708_s14 = scalar_lea.hbm %s1125_s1, 64 }
  0x5c   : > { %p704_p2 = scmp.ne.s32.totalorder %s1012_s29, %s703_s3  ;;  %p709_p1 = scmp.lt.u32.totalorder %s1012_s29, %s1125_s1 }
  0x5d   : > { %p710_p6 = scmp.lt.u32.totalorder %s708_s14, %s703_s3  ;;  %p712_p7 = scmp.lt.u32.totalorder %s703_s3, %s1012_s29 }
  0x5e   : > { %p706_p5 = pnand %p704_p2, %p675_p12 }
  0x5f   : > { %p711_p11 = por %p710_p6, %p709_p1 }
  0x60   : > { %p707_p0 = pneg %p706_p5 }
  0x61   : > { %p713_p3 = por %p712_p7, %p711_p11 }
  0x63   : > { %p714_p8 = pnand %p713_p3, %p707_p0 }
  0x65   : > { %717 = shalt.err (!%p714_p8)
}
  0x66   : > { %s718_s25 = scalar_lea.vmem %s238_s0, 32  ;;  %s834_s7 = smov [#allocation6]  }
  0x67   : > { %p719_p13 = scmp.ne.s32.totalorder %s238_s0, %s718_s25  ;;  %s723_s11 = sshll.u32 %s834_s7, 4  ;;  %s724_s11 = int_to_ptr.vmem [resolvable:$false] %s723_s11 }
  0x68   : > { %s725_s12 = scalar_lea.vmem %s724_s11, 64  ;;  %p726_p2 = scmp.lt.s32.totalorder %s238_s0, %s724_s11 }
  0x69   : > { %p721_p4 = pnand %p719_p13, %p675_p12  ;;  %p727_p5 = scmp.lt.s32.totalorder %s725_s12, %s718_s25 }
  0x6b   : > { %p722_p10 = pneg %p721_p4  ;;  %p728_p1 = por %p727_p5, %p726_p2 }
  0x6d   : > { %p729_p6 = pnand %p728_p1, %p722_p10 }
  0x6f   : > { %732 = shalt.err (!%p729_p6)
}
  0x70   : > { %578 = dma.hbm_to_vmem [thread:$0]  (!%p1149_p9), %s1012_s29, 32, %s238_s0, %s226_s2  }
  0x71   : > { %p1150_p0 = scmp.ne.s32.totalorder %s1144_s6, 0 }
  0x72   : > { %s1037_s3 = sand.u32 (!%p1150_p0), 1, %s811_s16   ;;  %p1151_p12 = scmp.ne.s32.totalorder (!%p1150_p0), %s1140_s26, 0 }
  0x73   : > { %246 = sbr.rel (%p1150_p0) target bundleno = 172 (0xac), region = 36  ;;  %s249_s30 = scalar_lea.sflag (!%p1150_p0), [#allocation3], %s1037_s3 }
  0x74   : > { %s549_s23 = smul.u32 (!%p1150_p0), 6, %s1037_s3 }
  0x76   : > { %s252_s8 = scalar_lea.vmem (!%p1150_p0), [#allocation2], %s549_s23 }
  0x7a   : > { %786 = dma.done.wait (%p1151_p12), %s249_s30, 96  }
  0x7b   : > { %788 = vsyncadd (%p1151_p12), %s249_s30, 4294967200  ;;  %s524_s0 = sshll.u32 %s1037_s3, 1  ;;  %s258_s2 = scalar_lea.sflag [#allocation7], %s1037_s3 }
  0x7c   : > { %s261_s6 = scalar_lea.vmem [#allocation6], %s524_s0 }
  0x7d   : > { %790 = dma.done.wait (%p1151_p12), %s258_s2, 32  }
  0x7e   : > { %792 = vsyncadd (%p1151_p12), %s258_s2, 4294967264  ;;  %p1152_p9 = scmp.ne.s32.totalorder %s1138_s24, 0 }
  0x80   : > { %794 = dma.done.wait (%p1152_p9), [#allocation5], 64  }
  0x81   : > { %796 = vsyncadd (%p1152_p9), [#allocation5], 4294967232 }
  0x82   : > { %798 = dma.done.wait (%p1152_p9), [#allocation10], 16  }
  0x83   : > { %800 = vsyncadd (%p1152_p9), [#allocation10], 4294967280 }
  0x84   : > { %274 = sfence }
  0x85   : > { %s529_s10 = sld [smem:[#allocation8 + $0x180]]  ;;  %v300_v0 = vld [vmem:[%s261_s6] sm:$0x3]  ;;  %s532_s26 = sld [smem:[#allocation8 + $0x181]]  ;;  %v301_v1 = vld [vmem:[%s252_s8] sm:$0x3] }
  0x86   : > { %s309_s29 = sld [smem:[#allocation8]]  ;;  %s533_s5 = sld [smem:[#allocation8 + $0x1]]  ;;  %v527_v2 = vld [vmem:[%s252_s8 + $0x2] sm:$0x3]  ;;  %v528_v4 = vld [vmem:[%s252_s8 + $0x4] sm:$0x3] }
  0x87   : > { %s530_s9 = sld [smem:[#allocation8 + $0x80]]  ;;  %s534_s25 = sld [smem:[#allocation8 + $0x81]] }
  0x88   : > { %s531_s14 = sld [smem:[#allocation8 + $0x100]]  ;;  %s535_s7 = sld [smem:[#allocation8 + $0x101]] }
  0x89   : > { %s1061_s21 = sld [smem:[#allocation9]]  ;;  %s538_s11 = sld [smem:[#allocation8 + $0x182]] }
  0x8a   : > { %s539_s24 = sld [smem:[#allocation8 + $0x2]]  ;;  %s1063_s30 = sld [smem:[#allocation9 + $0x1]] }
  0x8b   : > { %v307_v3 = vstv %s529_s10  ;;  %s540_s12 = sld [smem:[#allocation8 + $0x82]]  ;;  %v327_v11 = vstv %s532_s26  ;;  %s299_s2 = scalar_lea.vmem [#allocation11], %s549_s23 }
  0x8c   : > { %v308_v5 = vmul.f32 %v307_v3, %v300_v0  ;;  %v310_v6 = vstv %s309_s29  ;;  %s541_s0 = sld [smem:[#allocation8 + $0x102]]  ;;  %v328_v14 = vmul.f32 %v327_v11, %v300_v0  ;;  %v330_v15 = vstv %s533_s5  ;;  %s383_s6 = sshll.u32 %s299_s2, 4  ;;  %s1070_s6 = int_to_ptr.vmem [resolvable:$true] %s383_s6 }
  0x8d   : > { %v314_v7 = vstv %s530_s9  ;;  %v311_v8 = vmul.f32 %v310_v6, %v301_v1  ;;  %v331_v16 = vmul.f32 %v330_v15, %v301_v1  ;;  %v334_v17 = vstv %s534_s25  ;;  %s542_s8 = sld [smem:[#allocation9 + $0x2]]  ;;  %s550_s10 = smul.u32 96, %s819_s18 }
  0x8e   : > { %v315_v9 = vmul.f32 %v527_v2, %v314_v7  ;;  %v318_v10 = vstv %s531_s14  ;;  %v338_v18 = vstv %s535_s7  ;;  %v335_v21 = vmul.f32 %v527_v2, %v334_v17  ;;  %s369_s23 = scalar_lea.sflag [#allocation4], %s1037_s3  ;;  %s733_s26 = scalar_lea.vmem %s1070_s6, 96 }
  0x8f   : > { %v312_v12 = vadd.f32 %v311_v8, %v308_v5  ;;  %v319_v13 = vmul.f32 %v528_v4, %v318_v10  ;;  %v322_v20 = vstv %s1061_s21  ;;  %v339_v22 = vmul.f32 %v528_v4, %v338_v18  ;;  %s1075_s14 = scalar_lea.hbm %s1128_s4, %s550_s10  ;;  %p734_p11 = scmp.ne.s32.totalorder %s1070_s6, %s733_s26 }
  0x90   : > { %v332_v23 = vadd.f32 %v331_v16, %v328_v14  ;;  %v348_v24 = vstv %s538_s11  ;;  %v351_v25 = vstv %s539_s24  ;;  %v342_v34 = vstv %s1063_s30  ;;  %p1153_p7 = scmp.ne.s32.totalorder %s1141_s27, 0  ;;  %s835_s18 = smov [#allocation11]  }
  0x91   : > { %v316_v19 = vadd.f32 %v315_v9, %v312_v12  ;;  %v355_v26 = vstv %s540_s12  ;;  %v349_v28 = vmul.f32 %v348_v24, %v300_v0  ;;  %v352_v29 = vmul.f32 %v351_v25, %v301_v1  ;;  %s737_s21 = sshll.u32 %s835_s18, 4  ;;  %s738_s21 = int_to_ptr.vmem [resolvable:$false] %s737_s21 }
  0x92   : > { %v356_v30 = vmul.f32 %v527_v2, %v355_v26  ;;  %v336_v31 = vadd.f32 %v335_v21, %v332_v23  ;;  %v359_v32 = vstv %s541_s0  ;;  %p735_p3 = pnand %p734_p11, %p1153_p7  ;;  %s739_s5 = scalar_lea.vmem %s738_s21, 192 }
  0x93   : > { %v320_v27 = vadd.f32 %v319_v13, %v316_v19  ;;  %v353_v35 = vadd.f32 %v352_v29, %v349_v28  ;;  %v360_v36 = vmul.f32 %v528_v4, %v359_v32  ;;  %v363_v41 = vstv %s542_s8  ;;  %p740_p13 = scmp.lt.s32.totalorder %s1070_s6, %s738_s21  ;;  %p741_p4 = scmp.lt.s32.totalorder %s739_s5, %s733_s26 }
  0x94   : > { %v340_v37 = vadd.f32 %v339_v22, %v336_v31  ;;  %p736_p8 = pneg %p735_p3 }
  0x95   : > { %v323_v33 = vadd.f32 %v322_v20, %v320_v27  ;;  %v357_v39 = vadd.f32 %v356_v30, %v353_v35  ;;  %p742_p10 = por %p741_p4, %p740_p13 }
  0x96   : > { %v343_v40 = vadd.f32 %v342_v34, %v340_v37 }
  0x97   : > { %v324_v38 = vmax.f32 %v323_v33, 0.0  ;;  %v361_v42 = vadd.f32 %v360_v36, %v357_v39  ;;  %p743_p2 = pnand %p742_p10, %p736_p8 }
  0x98   : > { %v344_v43 = vmax.f32 %v343_v40, 0.0 }
  0x99   : > { %325 = vst [vmem:[%s299_s2] sm:$0x3] %v324_v38  ;;  %v364_v44 = vadd.f32 %v363_v41, %v361_v42 }
  0x9a   : > { %537 = vst [vmem:[%s299_s2 + $0x2] sm:$0x3] %v344_v43 }
  0x9b   : > { %v365_v45 = vmax.f32 %v364_v44, 0.0 }
  0x9d   : > { %543 = vst [vmem:[%s299_s2 + $0x4] sm:$0x3] %v365_v45 }
  0x9e   : > { %746 = shalt.err (!%p743_p2)
}
  0x9f   : > { %s747_s25 = scalar_lea.hbm %s1075_s14, 96  ;;  %s751_s24 = scalar_lea.hbm %s1128_s4, 192 }
  0xa0   : > { %p748_p5 = scmp.ne.s32.totalorder %s1075_s14, %s747_s25  ;;  %p752_p0 = scmp.lt.u32.totalorder %s1075_s14, %s1128_s4 }
  0xa1   : > { %p753_p12 = scmp.lt.u32.totalorder %s751_s24, %s747_s25  ;;  %p755_p11 = scmp.lt.u32.totalorder %s747_s25, %s1075_s14 }
  0xa2   : > { %p749_p1 = pnand %p748_p5, %p1153_p7 }
  0xa3   : > { %p754_p9 = por %p753_p12, %p752_p0 }
  0xa4   : > { %p750_p6 = pneg %p749_p1 }
  0xa5   : > { %p756_p3 = por %p755_p11, %p754_p9 }
  0xa7   : > { %p757_p8 = pnand %p756_p3, %p750_p6 }
  0xa9   : > { %760 = shalt.err (!%p757_p8)
}
  0xaa   : > { %s836_s0 = smov 32   ;;  %s837_s8 = smov 2  }
  0xab   : > { %563 = dma.vmem_to_hbm [thread:$0]  (%p1153_p7), %s1070_s6, 96, %s1075_s14, %s369_s23, %s836_s0, %s836_s0, %s837_s8  }
  0xac PF: > { %s398_s2 = sand.u32 1, %s807_s15   ;;  %p1154_p13 = scmp.ne.s32.totalorder %s1142_s28, 0 }
  0xad   : > { %p1155_p4 = scmp.ge.s32.totalorder %s827_s20, 2  ;;  %s399_s10 = scalar_lea.sflag [#allocation4], %s398_s2 }
  0xaf   : > { %p580_p10 = pnand %p1155_p4, %p1154_p13 }
  0xb1   : > { %802 = dma.done.wait (!%p580_p10), %s399_s10, 96  }
  0xb2   : > { %804 = vsyncadd (!%p580_p10), %s399_s10, 4294967200  ;;  %s25_s20 = sadd.s32 1, %s827_s20   ;;  %s1156_s15 = smov %s811_s16 }
  0xb3   : > { %p22_p2 = scmp.ge.s32.totalorder %s25_s20, 4   ;;  %s1157_s16 = smov %s815_s17 }
  0xb4   : > { %s1158_s17 = smov %s977_s13  ;;  %s1159_s18 = smov %s823_s19 }
  0xb5   : > { %s1160_s19 = smov %s1162_s22  ;;  %24 = sbr.rel (!%p22_p2) target bundleno = 14 (0xe), region = 107 }
  0xbc   :  { %404 = vsyncpa [#allocation3], 1 }
  0xbd   :  { %406 = vsyncpa [#allocation3 + $0x1], 1 }
  0xbe   :  { %407 = vsyncpa [#allocation7], 1 }
  0xbf   :  { %409 = vsyncpa [#allocation7 + $0x1], 1 }
  0xc0   :  { %410 = vsyncpa [#allocation4], 1 }
  0xc1   :  { %412 = vsyncpa [#allocation4 + $0x1], 1 }
  0xc2   :  { %413 = vsyncpa [#allocation5], 1 }
  0xc3   :  { %415 = vsyncpa [#allocation5 + $0x1], 1 }
  0xc4   :  { %416 = vsyncpa [#allocation10], 1 }

</bundles_post_ra>
